<compile_context>
chip_gen: v7x
topology: tpu7x:2x2x1
jax: 0.10.0
libtpu: 0.0.40
codegen_flags: <defaults>
</compile_context>

<pallas_src>
import jax
import jax.numpy as jnp
from jax import lax
from jax.experimental import pallas as pl
from jax.experimental.pallas import tpu as pltpu

BN_EPS = 1e-5
LANE = 128
SUBLANE = 8


def _round_up(n, m):
    return (n + m - 1) // m * m


# --------------------------------------------------------------------------- #
# Kernel
# --------------------------------------------------------------------------- #
def mlp_kernel(x_ref, w1_ref, b1_ref, w2_ref, b2_ref, w3_ref, b3_ref, o_ref):
    # x streamed straight from HBM in its original f32 layout; cast on the fly
    # for the MXU (accumulation stays f32).
    x = x_ref[...].astype(jnp.bfloat16)                                # (TB, D)

    # fc1 + ReLU                          (BN1 is folded into fc2's weights/bias)
    h1 = jnp.dot(x, w1_ref[...], preferred_element_type=jnp.float32) + b1_ref[...]
    h1 = jnp.maximum(h1, 0.0).astype(jnp.bfloat16)

    # fc2 (+ folded BN1) + ReLU           (BN2 is folded into fc3's weights/bias)
    h2 = jnp.dot(h1, w2_ref[...], preferred_element_type=jnp.float32) + b2_ref[...]
    h2 = jnp.maximum(h2, 0.0).astype(jnp.bfloat16)

    # fc3 (+ folded BN2), out_features == 1: N=1 matmul on the MXU (keeps the
    # reduction off the XLU, which only has 2 units on v6e/v7x).
    out = jnp.dot(h2, w3_ref[...], preferred_element_type=jnp.float32) + b3_ref[0, 0]
    o_ref[...] = out.astype(o_ref.dtype)


# --------------------------------------------------------------------------- #
# Wrapper-side parameter fusion (done once, outside the kernel)
# --------------------------------------------------------------------------- #
def fuse_params(p, *, eps=BN_EPS):
    """Fold eval-mode BN1/BN2 into fc2/fc3, zero-pad the hidden dims to
    multiples of 128, and cast the MXU operands to bf16. d_in stays unpadded
    (x is streamed unpadded)."""
    d_in, h1 = p["w1"].shape
    h2 = p["w2"].shape[1]

    s1 = p["g1"] * lax.rsqrt(p["v1"] + eps)        # (1, H1)
    t1 = p["be1"] - p["m1"] * s1
    s2 = p["g2"] * lax.rsqrt(p["v2"] + eps)        # (1, H2)
    t2 = p["be2"] - p["m2"] * s2

    w2f = s1.reshape(-1, 1) * p["w2"]              # BN1 folded into fc2
    b2f = p["b2"] + t1 @ p["w2"]
    w3f = s2.reshape(-1, 1) * p["w3"]              # BN2 folded into fc3 (H2, 1)
    b3f = p["b3"] + t2 @ p["w3"]                   # (1, 1)

    h1p = _round_up(h1, LANE)
    h2p = _round_up(h2, LANE)

    return dict(
        w1=jnp.pad(p["w1"], ((0, 0), (0, h1p - h1))).astype(jnp.bfloat16),   # (d_in, H1p)
        b1=jnp.pad(p["b1"], ((0, 0), (0, h1p - h1))),                        # (1, H1p) f32
        w2=jnp.pad(w2f, ((0, h1p - h1), (0, h2p - h2))).astype(jnp.bfloat16),# (H1p, H2p)
        b2=jnp.pad(b2f, ((0, 0), (0, h2p - h2))),                            # (1, H2p) f32
        w3=jnp.pad(w3f, ((0, h2p - h2), (0, 0))).astype(jnp.bfloat16),       # (H2p, 1)
        b3=b3f,                                                              # (1, 1) f32
    )


# --------------------------------------------------------------------------- #
# pallas_call wrapper
# --------------------------------------------------------------------------- #
def mlp_forward(x, fused, *, tile_b=8192, vmem_limit_bytes=48 * 1024 * 1024):
    """x: (B, input_dim) float32.  fused: output of fuse_params.  Returns (B, 1) f32.

    tile_b: batch rows per grid step. 8192 is a safe default on all
    generations; sweep 4096-16384 (up to ~32768 on v5e/v6e with
    vmem_limit_bytes ~96 MiB, since the (tb,128) f32 intermediates scale with
    the tile and v7x only has 64 MiB VMEM)."""
    B, d_in = x.shape
    w1, b1, w2, b2, w3, b3 = (fused[k] for k in ("w1", "b1", "w2", "b2", "w3", "b3"))
    assert w1.shape[0] == d_in, "w1 K-dim must match x's feature dim (unpadded)"
    h1p = w1.shape[1]
    h2p = w2.shape[1]

    # Batch tile: multiple of 8, no larger than the (rounded-up) batch.
    tb = max(SUBLANE, min(_round_up(tile_b, SUBLANE), _round_up(B, SUBLANE)))
    grid = (pl.cdiv(B, tb),)   # ragged last block is masked by Pallas

    def rep(shape):
        # weight / bias blocks: same full array at every grid step (resident)
        return pl.BlockSpec(shape, lambda i: (0,) * len(shape))

    in_specs = [
        pl.BlockSpec((tb, d_in), lambda i: (i, 0)),          # x tile (streamed, unpadded)
        rep((d_in, h1p)), rep((1, h1p)),                     # w1 (bf16), b1 (f32)
        rep((h1p, h2p)),  rep((1, h2p)),                     # w2 (bf16, BN1 folded), b2
        rep((h2p, 1)),                                       # w3 column (bf16, BN2 folded)
        pl.BlockSpec(memory_space=pltpu.MemorySpace.SMEM),   # b3 scalar
    ]
    out_spec = pl.BlockSpec((tb, 1), lambda i: (i, 0))

    # NOTE(v7x): if xprof shows one TensorCore idle, switch the batch axis to
    # pltpu.CORE_PARALLEL (plain "parallel" has near-zero codegen impact).
    return pl.pallas_call(
        mlp_kernel,
        out_shape=jax.ShapeDtypeStruct((B, 1), jnp.float32),
        grid=grid,
        in_specs=in_specs,
        out_specs=out_spec,
        compiler_params=pltpu.CompilerParams(
            dimension_semantics=("parallel",),
            vmem_limit_bytes=vmem_limit_bytes),
    )(x, w1, b1, w2, b2, w3, b3)


# --------------------------------------------------------------------------- #
# Parameter init (same shapes / init as the PyTorch module) and f32 reference
# --------------------------------------------------------------------------- #
def init_params(key, input_dim, hidden_dim1=128, hidden_dim2=64):
    ks = jax.random.split(key, 6)

    def linear(kw, kb, fan_in, fan_out):
        bound = 1.0 / jnp.sqrt(jnp.float32(fan_in))
        w = jax.random.uniform(kw, (fan_in, fan_out), jnp.float32, -bound, bound)
        b = jax.random.uniform(kb, (1, fan_out), jnp.float32, -bound, bound)
        return w, b

    w1, b1 = linear(ks[0], ks[1], input_dim, hidden_dim1)
    w2, b2 = linear(ks[2], ks[3], hidden_dim1, hidden_dim2)
    w3, b3 = linear(ks[4], ks[5], hidden_dim2, 1)

    return dict(
        w1=w1, b1=b1,
        g1=jnp.ones((1, hidden_dim1), jnp.float32),
        be1=jnp.zeros((1, hidden_dim1), jnp.float32),
        m1=jnp.zeros((1, hidden_dim1), jnp.float32),
        v1=jnp.ones((1, hidden_dim1), jnp.float32),
        w2=w2, b2=b2,
        g2=jnp.ones((1, hidden_dim2), jnp.float32),
        be2=jnp.zeros((1, hidden_dim2), jnp.float32),
        m2=jnp.zeros((1, hidden_dim2), jnp.float32),
        v2=jnp.ones((1, hidden_dim2), jnp.float32),
        w3=w3, b3=b3,
    )


def mlp_reference(x, p):
    """Pure-JAX f32 reference (eval-mode semantics)."""
    h1 = jnp.maximum(x @ p["w1"] + p["b1"], 0.0)
    h1 = (h1 - p["m1"]) * lax.rsqrt(p["v1"] + BN_EPS) * p["g1"] + p["be1"]
    h2 = jnp.maximum(h1 @ p["w2"] + p["b2"], 0.0)
    h2 = (h2 - p["m2"]) * lax.rsqrt(p["v2"] + BN_EPS) * p["g2"] + p["be2"]
    return h2 @ p["w3"] + p["b3"]


if __name__ == "__main__":
    key = jax.random.PRNGKey(0)
    kx, kp = jax.random.split(key)

    B, input_dim = 64, 32
    x = jax.random.normal(kx, (B, input_dim), jnp.float32)
    params = init_params(kp, input_dim, hidden_dim1=128, hidden_dim2=64)
    fused = fuse_params(params)

    # Small tile for the demo so the grid has multiple (4) pipelined steps.
    out = mlp_forward(x, fused, tile_b=16)
    out = jax.block_until_ready(out)

    ref = mlp_reference(x, params)
    assert out.shape == (B, 1)
    max_err = float(jnp.max(jnp.abs(out - ref)))
    assert jnp.allclose(out, ref, atol=3e-2, rtol=3e-2), f"mismatch vs reference: {max_err}"

    print("KERNEL_OK")
</pallas_src>

<mosaic_0001>
module attributes {stable_mosaic.version = 11 : i64} {
  func.func @mlp_kernel(%arg0: i32, %arg1: memref<16x32xf32, #tpu.memory_space<vmem>>, %arg2: memref<32x128xbf16, #tpu.memory_space<vmem>>, %arg3: memref<1x128xf32, #tpu.memory_space<vmem>>, %arg4: memref<128x128xbf16, #tpu.memory_space<vmem>>, %arg5: memref<1x128xf32, #tpu.memory_space<vmem>>, %arg6: memref<128x1xbf16, #tpu.memory_space<vmem>>, %arg7: memref<1x1xf32, #tpu.memory_space<smem>>, %arg8: memref<16x1xf32, #tpu.memory_space<vmem>>) attributes {dimension_semantics = [#tpu.dimension_semantics<parallel>], iteration_bounds = array<i64: 4>, scalar_prefetch = 0 : i64, scratch_operands = 0 : i64, tpu.core_type = #tpu.core_type<tc>, window_params = [{transform_indices = @transform_0, window_bounds = array<i64: 16, 32>}, {pipeline_mode = #tpu.pipeline_mode<synchronous>, transform_indices = @transform_1, window_bounds = array<i64: 32, 128>}, {pipeline_mode = #tpu.pipeline_mode<synchronous>, transform_indices = @transform_2, window_bounds = array<i64: 1, 128>}, {pipeline_mode = #tpu.pipeline_mode<synchronous>, transform_indices = @transform_3, window_bounds = array<i64: 128, 128>}, {pipeline_mode = #tpu.pipeline_mode<synchronous>, transform_indices = @transform_4, window_bounds = array<i64: 1, 128>}, {pipeline_mode = #tpu.pipeline_mode<synchronous>, transform_indices = @transform_5, window_bounds = array<i64: 128, 1>}, {transform_indices = @transform_6, window_bounds = array<i64: 1, 1>}, {transform_indices = @transform_7, window_bounds = array<i64: 16, 1>}]} {
    %c0 = arith.constant 0 : index
    %c0_0 = arith.constant 0 : index
    %0 = vector.load %arg1[%c0, %c0_0] : memref<16x32xf32, #tpu.memory_space<vmem>>, vector<16x32xf32>
    %1 = arith.truncf %0 : vector<16x32xf32> to vector<16x32xbf16>
    %c0_1 = arith.constant 0 : index
    %c0_2 = arith.constant 0 : index
    %2 = vector.load %arg2[%c0_1, %c0_2] : memref<32x128xbf16, #tpu.memory_space<vmem>>, vector<32x128xbf16>
    %cst = arith.constant dense<0.000000e+00> : vector<16x128xf32>
    %3 = tpu.matmul %1, %2, %cst {dimension_numbers = #tpu.dot_dimension_numbers<[1], [0], [0], [1], [0, 0, 1, 1], [], []>} : vector<16x32xbf16>, vector<32x128xbf16>, vector<16x128xf32> -> vector<16x128xf32>
    %c0_3 = arith.constant 0 : index
    %c0_4 = arith.constant 0 : index
    %4 = vector.load %arg3[%c0_3, %c0_4] : memref<1x128xf32, #tpu.memory_space<vmem>>, vector<1x128xf32>
    %5 = vector.broadcast %4 : vector<1x128xf32> to vector<16x128xf32>
    %6 = arith.addf %3, %5 : vector<16x128xf32>
    %cst_5 = arith.constant 0.000000e+00 : f32
    %7 = vector.broadcast %cst_5 : f32 to vector<16x128xf32>
    %8 = arith.maximumf %6, %7 : vector<16x128xf32>
    %9 = arith.truncf %8 : vector<16x128xf32> to vector<16x128xbf16>
    %c0_6 = arith.constant 0 : index
    %c0_7 = arith.constant 0 : index
    %10 = vector.load %arg4[%c0_6, %c0_7] : memref<128x128xbf16, #tpu.memory_space<vmem>>, vector<128x128xbf16>
    %cst_8 = arith.constant dense<0.000000e+00> : vector<16x128xf32>
    %11 = tpu.matmul %9, %10, %cst_8 {dimension_numbers = #tpu.dot_dimension_numbers<[1], [0], [0], [1], [0, 0, 1, 1], [], []>} : vector<16x128xbf16>, vector<128x128xbf16>, vector<16x128xf32> -> vector<16x128xf32>
    %c0_9 = arith.constant 0 : index
    %c0_10 = arith.constant 0 : index
    %12 = vector.load %arg5[%c0_9, %c0_10] : memref<1x128xf32, #tpu.memory_space<vmem>>, vector<1x128xf32>
    %13 = vector.broadcast %12 : vector<1x128xf32> to vector<16x128xf32>
    %14 = arith.addf %11, %13 : vector<16x128xf32>
    %cst_11 = arith.constant 0.000000e+00 : f32
    %15 = vector.broadcast %cst_11 : f32 to vector<16x128xf32>
    %16 = arith.maximumf %14, %15 : vector<16x128xf32>
    %17 = arith.truncf %16 : vector<16x128xf32> to vector<16x128xbf16>
    %c0_12 = arith.constant 0 : index
    %c0_13 = arith.constant 0 : index
    %18 = vector.load %arg6[%c0_12, %c0_13] : memref<128x1xbf16, #tpu.memory_space<vmem>>, vector<128x1xbf16>
    %cst_14 = arith.constant dense<0.000000e+00> : vector<16x1xf32>
    %19 = tpu.matmul %17, %18, %cst_14 {dimension_numbers = #tpu.dot_dimension_numbers<[1], [0], [0], [1], [0, 0, 1, 1], [], []>} : vector<16x128xbf16>, vector<128x1xbf16>, vector<16x1xf32> -> vector<16x1xf32>
    %c0_15 = arith.constant 0 : index
    %c0_16 = arith.constant 0 : index
    %20 = memref.load %arg7[%c0_15, %c0_16] : memref<1x1xf32, #tpu.memory_space<smem>>
    %21 = vector.broadcast %20 : f32 to vector<16x1xf32>
    %22 = arith.addf %19, %21 : vector<16x1xf32>
    %c0_17 = arith.constant 0 : index
    %c0_18 = arith.constant 0 : index
    %23 = vector.load %arg8[%c0_17, %c0_18] : memref<16x1xf32, #tpu.memory_space<vmem>>, vector<16x1xf32>
    tpu.vector_store %arg8[%c0_17, %c0_18], %22 {strides = array<i32>} : memref<16x1xf32, #tpu.memory_space<vmem>>, vector<16x1xf32>,
    return
  }
  func.func @transform_0(%arg0: i32) -> (i32, i32) {
    %c0_i32 = arith.constant 0 : i32
    %c0_i32_0 = arith.constant 0 : i32
    return %arg0, %c0_i32 : i32, i32
  }
  func.func @transform_1(%arg0: i32) -> (i32, i32) {
    %c0_i32 = arith.constant 0 : i32
    %c0_i32_0 = arith.constant 0 : i32
    %c0_i32_1 = arith.constant 0 : i32
    return %c0_i32, %c0_i32_0 : i32, i32
  }
  func.func @transform_2(%arg0: i32) -> (i32, i32) {
    %c0_i32 = arith.constant 0 : i32
    %c0_i32_0 = arith.constant 0 : i32
    %c0_i32_1 = arith.constant 0 : i32
    return %c0_i32, %c0_i32_0 : i32, i32
  }
  func.func @transform_3(%arg0: i32) -> (i32, i32) {
    %c0_i32 = arith.constant 0 : i32
    %c0_i32_0 = arith.constant 0 : i32
    %c0_i32_1 = arith.constant 0 : i32
    return %c0_i32, %c0_i32_0 : i32, i32
  }
  func.func @transform_4(%arg0: i32) -> (i32, i32) {
    %c0_i32 = arith.constant 0 : i32
    %c0_i32_0 = arith.constant 0 : i32
    %c0_i32_1 = arith.constant 0 : i32
    return %c0_i32, %c0_i32_0 : i32, i32
  }
  func.func @transform_5(%arg0: i32) -> (i32, i32) {
    %c0_i32 = arith.constant 0 : i32
    %c0_i32_0 = arith.constant 0 : i32
    %c0_i32_1 = arith.constant 0 : i32
    return %c0_i32, %c0_i32_0 : i32, i32
  }
  func.func @transform_6(%arg0: i32) -> (i32, i32) {
    %c0_i32 = arith.constant 0 : i32
    %c0_i32_0 = arith.constant 0 : i32
    %c0_i32_1 = arith.constant 0 : i32
    return %c0_i32, %c0_i32_0 : i32, i32
  }
  func.func @transform_7(%arg0: i32) -> (i32, i32) {
    %c0_i32 = arith.constant 0 : i32
    %c0_i32_0 = arith.constant 0 : i32
    return %arg0, %c0_i32 : i32, i32
  }
}

</mosaic_0001>

<bundles_post_ra>
// kernel: tpu_custom_call.1
= control target key start
LH: loop header
LB: loop body
LE: loop exit
PB: predicated region body
PF: predicated region fallthrough
CT: control target
= control target key end

     0   :  { %s821_s26 = smov 0   ;;  %s929_s0 = inlined_call_operand.vmem [shape: f32[64,32], index: 0, kind: input, shape index: {}]   ;;  %s930_s1 = inlined_call_operand.vmem [shape: bf16[32,128], index: 1, kind: input, shape index: {}]   ;;  %s931_s2 = inlined_call_operand.vmem [shape: f32[1,128], index: 2, kind: input, shape index: {}]   ;;  %s932_s3 = inlined_call_operand.vmem [shape: bf16[128,128], index: 3, kind: input, shape index: {}]   ;;  %s933_s4 = inlined_call_operand.vmem [shape: f32[1,128], index: 4, kind: input, shape index: {}]   ;;  %s934_s5 = inlined_call_operand.vmem [shape: bf16[128,1], index: 5, kind: input, shape index: {}]   ;;  %s935_s6 = inlined_call_operand.<no memory space> [shape: f32[1,1], index: 6, kind: input, shape index: {}]   ;;  %s936_s7 = inlined_call_operand.vmem [shape: f32[64,1], index: 7, kind: output, shape index: {}]  }
   0x1   :  { %12 = sst [smem:[#allocation2]] %s935_s6 }
   0x2 LB: > { %s639_s27 = sadd.s32 4294967295, %s774_s26   ;;  %p643_p0 = scmp.ge.s32.totalorder %s774_s26, 1  ;;  %s774_s26 = sphi %s821_s26, %s18_s26  }
   0x3   : > { %p239_p1 = scmp.lt.s32.totalorder %s774_s26, 5 }
   0x5   : > { %p240_p2 = pnand %p643_p0, %p239_p1 }
   0x6   : > { %v750_v0 = vld [vmem:[%s930_s1] sm:$0xff] (!%p240_p2)   ;;  %v776_v1 = vmov (!%p240_p2), 0.0   ;;  %v751_v2 = vld [vmem:[%s930_s1 + $0x8] sm:$0xff] (!%p240_p2)   ;;  %vm777_vm0 = vmmov (!%p240_p2), 0   ;;  %s644_s8 = sshll.u32 (!%p240_p2), %s639_s27, 1  ;;  %v754_v5 = vld [vmem:[%s932_s3 + $0x10] sm:$0xff] (!%p240_p2)  }
   0x7   : > { %243 = sbr.rel (%p240_p2) target bundleno = 677 (0x2a5), region = 48  ;;  %692 = vmatprep.subr.bf16.mxu0 (!%p240_p2), %v776_v1  ;;  %700 = vmatprep.subr.bf16.mxu1 (!%p240_p2), %v776_v1  ;;  %p272_p3 = scmp.lt.s32.totalorder (!%p240_p2), %s644_s8, 7  ;;  %v752_v3 = vld [vmem:[%s932_s3] sm:$0xff] (!%p240_p2)   ;;  %v753_v4 = vld [vmem:[%s932_s3 + $0x8] sm:$0xff] (!%p240_p2)   ;;  %vm310_vm1 = vcmask (!%p240_p2), 261120   ;;  %v755_v9 = vld [vmem:[%s932_s3 + $0x18] sm:$0xff] (!%p240_p2)  }
   0x8   : > { %693 = vmatpush3.bf16.msra.mxu0 (!%p240_p2), %v750_v0  ;;  %696 = vmatprep.mubr.msk.bf16.mxu0 (!%p240_p2), %vm777_vm0, %v776_v1  ;;  %v756_v10 = vld [vmem:[%s932_s3 + $0x20] sm:$0xff] (!%p240_p2)   ;;  %v757_v11 = vld [vmem:[%s932_s3 + $0x28] sm:$0xff] (!%p240_p2)   ;;  %v758_v12 = vld [vmem:[%s932_s3 + $0x30] sm:$0xff] (!%p240_p2)   ;;  %s489_s29 = sld [smem:[#allocation2]] (!%p240_p2)  ;;  %vm580_vm2 = vcmask (!%p240_p2), 7168  }
   0x9   : > { %694 = vmatprep.subr.bf16.mxu0 (!%p240_p2), %v776_v1  ;;  %716 = vmatprep.mubr.msk.bf16.mxu1 (!%p240_p2), %vm777_vm0, %v776_v1  ;;  %v759_v13 = vld [vmem:[%s932_s3 + $0x38] sm:$0xff] (!%p240_p2)   ;;  %v760_v14 = vld [vmem:[%s934_s5] sm:$0xff] (!%p240_p2)   ;;  %v761_v15 = vld [vmem:[%s934_s5 + $0x8] sm:$0xff] (!%p240_p2)  }
   0xa   : > { %701 = vmatpush3.bf16.msra.mxu1 (!%p240_p2), %v752_v3  ;;  %v762_v16 = vld [vmem:[%s934_s5 + $0x10] sm:$0xff] (!%p240_p2)   ;;  %v763_v17 = vld [vmem:[%s934_s5 + $0x18] sm:$0xff] (!%p240_p2)   ;;  %v764_v18 = vld [vmem:[%s934_s5 + $0x20] sm:$0xff] (!%p240_p2)  }
   0xb   : > { %702 = vmatprep.subr.bf16.mxu1 (!%p240_p2), %v776_v1  ;;  %v765_v19 = vld [vmem:[%s934_s5 + $0x28] sm:$0xff] (!%p240_p2)   ;;  %v648_v20 = vld [vmem:[%s931_s2] ss:$0 sm:$0xff] (!%p240_p2)  ;;  %v766_v30 = vld [vmem:[%s934_s5 + $0x30] sm:$0xff] (!%p240_p2)  }
   0xc   : > { %695 = vmatpush3.bf16.msra.mxu0 (!%p240_p2), %v751_v2  ;;  %v767_v31 = vld [vmem:[%s934_s5 + $0x38] sm:$0xff] (!%p240_p2)   ;;  %v652_v32 = vld [vmem:[%s933_s4] ss:$0 sm:$0xff] (!%p240_p2) }
   0xd   : > { %720 = vmatprep.subr.bf16.mxu0 (!%p240_p2), %v776_v1 }
   0xe   : > { %s938_s8 = smov (!%p272_p3, %s644_s8), 7  ;;  %703 = vmatpush3.bf16.msra.mxu1 %v753_v4  ;;  %v490_v42 = vstv %s489_s29 }
   0xf   : > { %s645_s13 = sshll.u32 %s938_s8, 3  ;;  %704 = vmatprep.subr.bf16.mxu1 %v776_v1 }
  0x10   : > { %s275_s16 = scalar_lea.vmem %s929_s0, %s645_s13  ;;  %s281_s9 = scalar_lea.vmem %s936_s7, %s645_s13 }
  0x11   : > { %v284_v6 = vld [vmem:[%s275_s16] sm:$0xff]  ;;  %v285_v7 = vld [vmem:[%s275_s16 + $0x8] sm:$0xff] }
  0x12   : > { %v286_v8 = vpack.c.bf16 %v285_v7, %v284_v6  ;;  %705 = vmatpush3.bf16.msra.mxu1 %v754_v5 }
  0x13   : > { %706 = vmatprep.subr.bf16.mxu1 %v776_v1 }
  0x14   : > { %697 = vmatmul.mubr.msk.bf16.vlgmr.msra.gmra.mrb[0].mxu0 %vm310_vm1, %v286_v8 }
  0x15   : > { %736 = vmatprep.mubr.msk.bf16.mxu0 %vm777_vm0, %v776_v1  ;;  %721 = vmatpush3.bf16.msra.mxu0 %v760_v14 }
  0x16   : > { %707 = vmatpush3.bf16.msra.mxu1 %v755_v9  ;;  %722 = vmatprep.subr.bf16.mxu0 %v776_v1 }
  0x17   : > { %708 = vmatprep.subr.bf16.mxu1 %v776_v1 }
  0x19   : > { %723 = vmatpush3.bf16.msra.mxu0 %v761_v15 }
  0x1a   : > { %709 = vmatpush3.bf16.msra.mxu1 %v756_v10  ;;  %724 = vmatprep.subr.bf16.mxu0 %v776_v1 }
  0x1b   : > { %710 = vmatprep.subr.bf16.mxu1 %v776_v1 }
  0x1d   : > { %725 = vmatpush3.bf16.msra.mxu0 %v762_v16 }
  0x1e   : > { %711 = vmatpush3.bf16.msra.mxu1 %v757_v11  ;;  %726 = vmatprep.subr.bf16.mxu0 %v776_v1 }
  0x1f   : > { %712 = vmatprep.subr.bf16.mxu1 %v776_v1 }
  0x21   : > { %727 = vmatpush3.bf16.msra.mxu0 %v763_v17 }
  0x22   : > { %713 = vmatpush3.bf16.msra.mxu1 %v758_v12  ;;  %728 = vmatprep.subr.bf16.mxu0 %v776_v1 }
  0x23   : > { %714 = vmatprep.subr.bf16.mxu1 %v776_v1 }
  0x25   : > { %729 = vmatpush3.bf16.msra.mxu0 %v764_v18 }
  0x26   : > { %715 = vmatpush3.bf16.msra.mxu1 %v759_v13  ;;  %730 = vmatprep.subr.bf16.mxu0 %v776_v1 }
  0x29   : > { %731 = vmatpush3.bf16.msra.mxu0 %v765_v19 }
  0x2a   : > { %732 = vmatprep.subr.bf16.mxu0 %v776_v1 }
  0x2d   : > { %733 = vmatpush3.bf16.msra.mxu0 %v766_v30 }
  0x2e   : > { %734 = vmatprep.subr.bf16.mxu0 %v776_v1 }
  0x31   : > { %735 = vmatpush3.bf16.msra.mxu0 %v767_v31 }
  0xe7   : > { %v348_v21 = vpop.f32.mrb[0].mxu0 }
  0xe8   : > { %v349_v22 = vadd.f32 %v648_v20, %v348_v21  ;;  %v698_v23 = vpop.f32.mrb[1].mxu0 }
  0xe9   : > { %v351_v24 = vpop.f32.mrb[2].mxu0 }
  0xea   : > { %v352_v25 = vadd.f32 %v648_v20, %v351_v24  ;;  %v699_v26 = vpop.f32.mrb[3].mxu0  ;;  %v355_v27 = vmax.f32 %v349_v22, 0.0 }
  0xec   : > { %v356_v28 = vmax.f32 %v352_v25, 0.0 }
  0xee   : > { %v357_v29 = vpack.c.bf16 %v356_v28, %v355_v27 }
  0xf0   : > { %717 = vmatmul.mubr.bf16.vlgmr.msra.gmra.mrb[0].mxu1 %v357_v29 }
 0x1c3   : > { %v463_v33 = vpop.f32.mrb[0].mxu1 }
 0x1c4   : > { %v464_v34 = vadd.f32 %v652_v32, %v463_v33  ;;  %v718_v35 = vpop.f32.mrb[1].mxu1 }
 0x1c5   : > { %v466_v36 = vpop.f32.mrb[2].mxu1 }
 0x1c6   : > { %v467_v37 = vadd.f32 %v652_v32, %v466_v36  ;;  %v719_v38 = vpop.f32.mrb[3].mxu1  ;;  %v470_v39 = vmax.f32 %v464_v34, 0.0 }
 0x1c8   : > { %v471_v40 = vmax.f32 %v467_v37, 0.0 }
 0x1ca   : > { %v472_v41 = vpack.c.bf16 %v471_v40, %v470_v39 }
 0x1cc   : > { %737 = vmatmul.mubr.bf16.vlgmr.msra.gmra.mrb[4].mxu0 %v472_v41 }
 0x29f   : > { %v573_v43 = vpop.f32.mrb[4].mxu0 }
 0x2a0   : > { %v574_v44 = vadd.f32 %v573_v43, %v490_v42  ;;  %v738_v45 = vpop.f32.mrb[5].mxu0 }
 0x2a1   : > { %v576_v46 = vpop.f32.mrb[6].mxu0 }
 0x2a2   : > { %581 = vst.msk [vmem:[%s281_s9] sm:$0xff] %vm580_vm2, %v574_v44  ;;  %v577_v47 = vadd.f32 %v576_v46, %v490_v42  ;;  %v739_v48 = vpop.f32.mrb[7].mxu0 }
 0x2a4   : > { %582 = vst.msk [vmem:[%s281_s9 + $0x8] sm:$0xff] %vm580_vm2, %v577_v47 }
 0x2a5 PF: > { %s18_s26 = sadd.s32 1, %s774_s26  }
 0x2a6   : > { %p15_p4 = scmp.ge.s32.totalorder %s18_s26, 6  }
 0x2a8   :  { %17 = sbr.rel (!%p15_p4) target bundleno = 2 (0x2), region = 78 }

</bundles_post_ra>
